<compile_context>
chip_gen: v5e
topology: v5e:2x2
jax: 0.10.0
libtpu: 0.0.40
codegen_flags: <defaults>
</compile_context>

<pallas_src>
import functools

import jax
import jax.numpy as jnp
from jax.experimental import pallas as pl
from jax.experimental.pallas import tpu as pltpu

SUBLANE = 8              # vreg sublane granularity for the batch (second-to-last) dim
TB_CAP = 4096            # max batch-tile rows (VMEM budget comment in wrapper)
MIN_PALLAS_BATCH = 256   # below this, fused XLA matches/beats kernel launch overhead


def _cdiv(a, b):
    return (a + b - 1) // b


def _round_up(n, m):
    return _cdiv(n, m) * m


def _mlp_kernel(x_ref, w1_ref, b1_ref, w2_ref, b2_ref, o_ref):
    """Fused Linear -> ReLU -> Linear on one (TB, Din) batch tile.

    x / W1 / W2 are bf16 (native MXU rate on all generations, half the DMA bytes);
    accumulation and the bias+ReLU epilogue are f32 on the VPU.
    """
    h = jnp.dot(x_ref[...], w1_ref[...], preferred_element_type=jnp.float32)
    h = jnp.maximum(h + b1_ref[...], 0.0)                       # (TB, H) + (1, H), ReLU
    y = jnp.dot(h.astype(jnp.bfloat16), w2_ref[...],
                preferred_element_type=jnp.float32)
    o_ref[...] = (y + b2_ref[...]).astype(o_ref.dtype)


def prepare_params(w1, b1, w2, b2):
    """Cast weights to bf16 MXU operands and biases to f32 row vectors.

    No feature padding: full-dim BlockSpecs handle Din/H/Y that aren't multiples
    of 128, and keeping the logical sizes minimizes streamed HBM bytes.
    """
    return (w1.astype(jnp.bfloat16),
            b1.astype(jnp.float32).reshape(1, -1),
            w2.astype(jnp.bfloat16),
            b2.astype(jnp.float32).reshape(1, -1))


def _pick_batch_tile(B):
    """Sublane-aligned batch tile.

    >=2 grid steps whenever B > SUBLANE so the 'parallel' batch axis can shard
    across v7x's two TensorCores, and tile size adapts to B so the padded batch
    Bp wastes less than one sublane-group per tile.
    """
    if B <= SUBLANE:
        return SUBLANE
    n_tiles = max(2, _cdiv(B, TB_CAP))
    return min(TB_CAP, _round_up(_cdiv(B, n_tiles), SUBLANE))


@functools.partial(jax.jit, static_argnames=("force_pallas",))
def network1d_forward(x, w1, b1, w2, b2, *, force_pallas=False):
    """Forward pass of Network1D.

    x  : (B, x_dim) or (x_dim,)  -- apply_tensor_constraints unsqueezes 1-D input.
    w1 : (Din, H) bf16   b1: (1, H) f32   w2: (H, Y) bf16   b2: (1, Y) f32
    returns (B, Y) float32
    """
    if x.ndim == 1:                      # apply_tensor_constraints
        x = x[None, :]
    B, din = x.shape
    hdim = w1.shape[1]
    ydim = w2.shape[1]

    if B < MIN_PALLAS_BATCH and not force_pallas:
        # Tiny batches are pure dispatch overhead in a kernel; use fused XLA with
        # identical numerics (bf16 MXU operands, f32 accumulate/epilogue).
        h = jnp.maximum(
            jnp.dot(x.astype(jnp.bfloat16), w1,
                    preferred_element_type=jnp.float32) + b1, 0.0)
        return jnp.dot(h.astype(jnp.bfloat16), w2,
                       preferred_element_type=jnp.float32) + b2

    tb = _pick_batch_tile(B)
    Bp = _round_up(B, tb)
    grid = Bp // tb

    xb = x.astype(jnp.bfloat16)
    if Bp != B:
        xb = jnp.pad(xb, ((0, Bp - B), (0, 0)))     # zero rows, sliced off below

    # VMEM budget: double-buffered x tile (TB*Din*2B) + out tile (TB*Y*4B) plus the
    # f32 hidden temp (TB*H*4B) and resident weights. At TB=4096, Din=16, H=32, Y=4
    # that is < 1 MiB -- far under the 32 MiB we request (v5e's scoped default is
    # only 16 MiB, hence the explicit limit).
    flops = 2 * Bp * (din * hdim + hdim * ydim)
    bytes_accessed = (2 * Bp * din + 2 * din * hdim + 4 * hdim
                      + 2 * hdim * ydim + 4 * ydim + 4 * Bp * ydim)

    out = pl.pallas_call(
        _mlp_kernel,
        out_shape=jax.ShapeDtypeStruct((Bp, ydim), jnp.float32),
        grid=(grid,),
        in_specs=[
            # x tile streams per grid step; unpadded full-dim last axis keeps the
            # streamed bytes at the logical size (no 8x lane-padding blow-up).
            pl.BlockSpec((tb, din), lambda i: (i, 0)),
            # Weights/biases: constant index_map -> resident in VMEM across steps.
            pl.BlockSpec((din, hdim), lambda i: (0, 0)),
            pl.BlockSpec((1, hdim), lambda i: (0, 0)),
            pl.BlockSpec((hdim, ydim), lambda i: (0, 0)),
            pl.BlockSpec((1, ydim), lambda i: (0, 0)),
        ],
        # Unpadded (full-dim) output: Y=4 means masked stores, but 32x fewer output
        # HBM bytes than a 128-lane-padded slab and no post-kernel feature slice.
        out_specs=pl.BlockSpec((tb, ydim), lambda i: (i, 0)),
        compiler_params=pltpu.CompilerParams(
            dimension_semantics=("parallel",),   # shard batch tiles across TCs (v7x)
            vmem_limit_bytes=32 * 1024 * 1024,
        ),
        cost_estimate=pl.CostEstimate(
            flops=flops, transcendentals=0, bytes_accessed=bytes_accessed),
    )(xb, w1, b1, w2, b2)

    return out[:B] if Bp != B else out


def init_network1d_params(key, x_dim, y_dim, hidden_dim=(32,)):
    """Deterministic init mimicking nn.Linear's U(-1/sqrt(fan_in), 1/sqrt(fan_in))."""
    assert len(hidden_dim) == 1, "script instantiates the default single hidden layer"
    din, h, dout = x_dim[0], hidden_dim[0], y_dim[0]
    k1, k2, k3, k4 = jax.random.split(key, 4)
    bnd1 = 1.0 / jnp.sqrt(din)
    bnd2 = 1.0 / jnp.sqrt(h)
    w1 = jax.random.uniform(k1, (din, h), jnp.float32, -bnd1, bnd1)
    b1 = jax.random.uniform(k2, (h,), jnp.float32, -bnd1, bnd1)
    w2 = jax.random.uniform(k3, (h, dout), jnp.float32, -bnd2, bnd2)
    b2 = jax.random.uniform(k4, (dout,), jnp.float32, -bnd2, bnd2)
    return w1, b1, w2, b2


if __name__ == "__main__":
    key = jax.random.PRNGKey(0)
    kp, kx, kxl = jax.random.split(key, 3)

    x_dim = (16,)        # input feature dim
    y_dim = (4,)         # output dim
    hidden_dim = (32,)   # default hidden layer
    batch = 8

    w1f, b1f, w2f, b2f = init_network1d_params(kp, x_dim, y_dim, hidden_dim)
    w1, b1, w2, b2 = prepare_params(w1f, b1f, w2f, b2f)

    def ref_f32(xs):     # pure-f32 reference of the module's forward semantics
        return jnp.maximum(xs @ w1f + b1f, 0.0) @ w2f + b2f

    # Small batch through the Pallas path (forced; default dispatch would fall back).
    x = jax.random.normal(kx, (batch, x_dim[0]), jnp.float32)
    out = network1d_forward(x, w1, b1, w2, b2, force_pallas=True)
    jax.block_until_ready(out)
    assert out.shape == (batch, y_dim[0])
    assert jnp.allclose(out, ref_f32(x), atol=5e-2, rtol=5e-2)   # bf16 MXU operands

    # 1-D input exercises apply_tensor_constraints (unsqueeze to (1, Din)).
    out1d = network1d_forward(x[0], w1, b1, w2, b2, force_pallas=True)
    jax.block_until_ready(out1d)
    assert out1d.shape == (1, y_dim[0])
    assert jnp.allclose(out1d, ref_f32(x)[:1], atol=5e-2, rtol=5e-2)

    # Larger, uneven batch takes the Pallas path naturally: adaptive TB=504,
    # 2-step grid (megacore-parallel on v7x), batch padding exercised.
    xl = jax.random.normal(kxl, (1000, x_dim[0]), jnp.float32)
    outl = network1d_forward(xl, w1, b1, w2, b2)
    jax.block_until_ready(outl)
    assert outl.shape == (1000, y_dim[0])
    assert jnp.allclose(outl, ref_f32(xl), atol=5e-2, rtol=5e-2)

    # Small-batch default dispatch (fused XLA fallback) stays consistent with kernel.
    out_fb = network1d_forward(x, w1, b1, w2, b2)
    jax.block_until_ready(out_fb)
    assert jnp.allclose(out_fb, out, atol=5e-2, rtol=5e-2)

    print("KERNEL_OK")
</pallas_src>

<mosaic_0001>
module attributes {stable_mosaic.version = 11 : i64} {
  func.func @_mlp_kernel(%arg0: i32, %arg1: memref<8x16xbf16, #tpu.memory_space<vmem>>, %arg2: memref<16x32xbf16, #tpu.memory_space<vmem>>, %arg3: memref<1x32xf32, #tpu.memory_space<vmem>>, %arg4: memref<32x4xbf16, #tpu.memory_space<vmem>>, %arg5: memref<1x4xf32, #tpu.memory_space<vmem>>, %arg6: memref<8x4xf32, #tpu.memory_space<vmem>>) attributes {dimension_semantics = [#tpu.dimension_semantics<parallel>], iteration_bounds = array<i64: 1>, scalar_prefetch = 0 : i64, scratch_operands = 0 : i64, tpu.core_type = #tpu.core_type<tc>, window_params = [{transform_indices = @transform_0, window_bounds = array<i64: 8, 16>}, {pipeline_mode = #tpu.pipeline_mode<synchronous>, transform_indices = @transform_1, window_bounds = array<i64: 16, 32>}, {pipeline_mode = #tpu.pipeline_mode<synchronous>, transform_indices = @transform_2, window_bounds = array<i64: 1, 32>}, {pipeline_mode = #tpu.pipeline_mode<synchronous>, transform_indices = @transform_3, window_bounds = array<i64: 32, 4>}, {pipeline_mode = #tpu.pipeline_mode<synchronous>, transform_indices = @transform_4, window_bounds = array<i64: 1, 4>}, {transform_indices = @transform_5, window_bounds = array<i64: 8, 4>}]} {
    %c0 = arith.constant 0 : index
    %c0_0 = arith.constant 0 : index
    %0 = vector.load %arg1[%c0, %c0_0] : memref<8x16xbf16, #tpu.memory_space<vmem>>, vector<8x16xbf16>
    %c0_1 = arith.constant 0 : index
    %c0_2 = arith.constant 0 : index
    %1 = vector.load %arg2[%c0_1, %c0_2] : memref<16x32xbf16, #tpu.memory_space<vmem>>, vector<16x32xbf16>
    %cst = arith.constant dense<0.000000e+00> : vector<8x32xf32>
    %2 = tpu.matmul %0, %1, %cst {dimension_numbers = #tpu.dot_dimension_numbers<[1], [0], [0], [1], [0, 0, 1, 1], [], []>} : vector<8x16xbf16>, vector<16x32xbf16>, vector<8x32xf32> -> vector<8x32xf32>
    %c0_3 = arith.constant 0 : index
    %c0_4 = arith.constant 0 : index
    %3 = vector.load %arg3[%c0_3, %c0_4] : memref<1x32xf32, #tpu.memory_space<vmem>>, vector<1x32xf32>
    %4 = vector.broadcast %3 : vector<1x32xf32> to vector<8x32xf32>
    %5 = arith.addf %2, %4 : vector<8x32xf32>
    %cst_5 = arith.constant 0.000000e+00 : f32
    %6 = vector.broadcast %cst_5 : f32 to vector<8x32xf32>
    %7 = arith.maximumf %5, %6 : vector<8x32xf32>
    %8 = arith.truncf %7 : vector<8x32xf32> to vector<8x32xbf16>
    %c0_6 = arith.constant 0 : index
    %c0_7 = arith.constant 0 : index
    %9 = vector.load %arg4[%c0_6, %c0_7] : memref<32x4xbf16, #tpu.memory_space<vmem>>, vector<32x4xbf16>
    %cst_8 = arith.constant dense<0.000000e+00> : vector<8x4xf32>
    %10 = tpu.matmul %8, %9, %cst_8 {dimension_numbers = #tpu.dot_dimension_numbers<[1], [0], [0], [1], [0, 0, 1, 1], [], []>} : vector<8x32xbf16>, vector<32x4xbf16>, vector<8x4xf32> -> vector<8x4xf32>
    %c0_9 = arith.constant 0 : index
    %c0_10 = arith.constant 0 : index
    %11 = vector.load %arg5[%c0_9, %c0_10] : memref<1x4xf32, #tpu.memory_space<vmem>>, vector<1x4xf32>
    %12 = vector.broadcast %11 : vector<1x4xf32> to vector<8x4xf32>
    %13 = arith.addf %10, %12 : vector<8x4xf32>
    %c0_11 = arith.constant 0 : index
    %c0_12 = arith.constant 0 : index
    %14 = vector.load %arg6[%c0_11, %c0_12] : memref<8x4xf32, #tpu.memory_space<vmem>>, vector<8x4xf32>
    tpu.vector_store %arg6[%c0_11, %c0_12], %13 {strides = array<i32>} : memref<8x4xf32, #tpu.memory_space<vmem>>, vector<8x4xf32>,
    return
  }
  func.func @transform_0(%arg0: i32) -> (i32, i32) {
    %c0_i32 = arith.constant 0 : i32
    %c0_i32_0 = arith.constant 0 : i32
    return %arg0, %c0_i32 : i32, i32
  }
  func.func @transform_1(%arg0: i32) -> (i32, i32) {
    %c0_i32 = arith.constant 0 : i32
    %c0_i32_0 = arith.constant 0 : i32
    %c0_i32_1 = arith.constant 0 : i32
    return %c0_i32, %c0_i32_0 : i32, i32
  }
  func.func @transform_2(%arg0: i32) -> (i32, i32) {
    %c0_i32 = arith.constant 0 : i32
    %c0_i32_0 = arith.constant 0 : i32
    %c0_i32_1 = arith.constant 0 : i32
    return %c0_i32, %c0_i32_0 : i32, i32
  }
  func.func @transform_3(%arg0: i32) -> (i32, i32) {
    %c0_i32 = arith.constant 0 : i32
    %c0_i32_0 = arith.constant 0 : i32
    %c0_i32_1 = arith.constant 0 : i32
    return %c0_i32, %c0_i32_0 : i32, i32
  }
  func.func @transform_4(%arg0: i32) -> (i32, i32) {
    %c0_i32 = arith.constant 0 : i32
    %c0_i32_0 = arith.constant 0 : i32
    %c0_i32_1 = arith.constant 0 : i32
    return %c0_i32, %c0_i32_0 : i32, i32
  }
  func.func @transform_5(%arg0: i32) -> (i32, i32) {
    %c0_i32 = arith.constant 0 : i32
    %c0_i32_0 = arith.constant 0 : i32
    return %arg0, %c0_i32 : i32, i32
  }
}

</mosaic_0001>

<bundles_post_ra>
// kernel: network1d_forward.1
= control target key start
LH: loop header
LB: loop body
LE: loop exit
PB: predicated region body
PF: predicated region fallthrough
CT: control target
= control target key end

     0   :  { %vm34_vm0 = vcmask 130048   ;;  %vm73_vm1 = vcmask 261120   ;;  %vm90_vm2 = vcmask 31744   ;;  %s166_s1 = inlined_call_operand.vmem [shape: bf16[16,32], index: 1, kind: input, shape index: {}]   ;;  %s167_s0 = inlined_call_operand.vmem [shape: bf16[8,16], index: 0, kind: input, shape index: {}]   ;;  %s168_s2 = inlined_call_operand.vmem [shape: f32[1,32], index: 2, kind: input, shape index: {}]   ;;  %s169_s4 = inlined_call_operand.vmem [shape: f32[1,4], index: 4, kind: input, shape index: {}]   ;;  %s170_s3 = inlined_call_operand.vmem [shape: bf16[32,4], index: 3, kind: input, shape index: {}]   ;;  %s171_s5 = inlined_call_operand.vmem [shape: f32[8,4], index: 5, kind: output, shape index: {}]  }
   0x1   :  { %v110_v0 = vld [vmem:[%s166_s1] sm:$0xff]  ;;  %v112_v2 = vld [vmem:[%s170_s3 + $0x8] sm:$0xff] }
   0x2   :  { %45 = vmatpush.bf16.msra.mxu0 %v110_v0  ;;  %v21_v1 = vld [vmem:[%s167_s0] sm:$0xf]  ;;  %83 = vmatpush.bf16.msra.mxu1 %v112_v2 }
   0x3   :  { %v111_v3 = vld [vmem:[%s170_s3] sm:$0xff] }
   0x4   :  { %v113_v4 = vld [vmem:[%s168_s2] ss:$0 sm:$0xff] }
   0x5   :  { %100 = vmatmul.msk.bf16.vlgmr.msra.gmra.mxu0 %vm34_vm0, %v21_v1  ;;  %v114_v10 = vld [vmem:[%s169_s4] ss:$0 sm:$0xff] }
   0x6   :  { %84 = vmatpush.bf16.msra.mxu1 %v111_v3 }
  0x82   :  { %v47_v5 = vpop.f32.mrf.mxu0 }
  0x83   :  { %v48_v6 = vadd.f32 %v113_v4, %v47_v5 }
  0x85   :  { %v51_v7 = vmax.f32 %v48_v6, 0.0 }
  0x87   :  { %v52_v8 = vpack.c.bf16 %v51_v7, %v51_v7 }
  0x89   :  { %109 = vmatmul.msk.bf16.vlgmr.msra.gmra.mxu1 %vm73_vm1, %v52_v8 }
  0x8a   :  { %v49_v9 = vpop.f32.mrf.mxu0 }
 0x106   :  { %v86_v11 = vpop.f32.mrf.mxu1 }
 0x107   :  { %v87_v12 = vadd.f32 %v114_v10, %v86_v11 }
 0x109   :  { %91 = vst.msk [vmem:[%s171_s5] sm:$0xff] %vm90_vm2, %v87_v12 }
 0x10e   :  { %v88_v13 = vpop.f32.mrf.mxu1 }

</bundles_post_ra>
